<compile_context>
chip_gen: v6e
topology: v6e:2x2x1
jax: 0.10.0
libtpu: 0.0.40
codegen_flags: <defaults>
</compile_context>

<pallas_src>
import functools

import jax
import jax.numpy as jnp
from jax import lax
from jax.experimental import pallas as pl
from jax.experimental.pallas import tpu as pltpu


def _round_up(n, m):
    return ((n + m - 1) // m) * m


_NEG_BIG = -1e30  # finite sentinel: exp(sentinel + finite) == 0, never NaN


def _mmd_tile_kernel(two_z_ref,
                     x_row_ref, y_row_ref, x_col_ref, y_col_ref,
                     zsqx_row_ref, zsqy_row_ref, zsqx_col_ref, zsqy_col_ref,
                     out_ref, *scratch,
                     beta, gamma, num_k, single_k):
    i = pl.program_id(0)          # row-block index   ("parallel")
    j = pl.program_id(1)          # col-block index   ("arbitrary" reduction)
    k = pl.program_id(2)          # D-chunk index     ("arbitrary" reduction)
    nj = pl.num_programs(1)

    acc_ref = scratch[0]          # (tm, tn) f32 running sum for this row block

    @pl.when((j == 0) & (k == 0))
    def _init_acc():
        acc_ref[...] = jnp.zeros_like(acc_ref)

    two_z = two_z_ref[0]
    nt = (((1,), (1,)), ((), ()))  # contract last dims of both operands (NT form)
    xr = x_row_ref[...]            # (tm, dk) native dtype
    yr = y_row_ref[...]
    xc = x_col_ref[...]            # (tn, dk)
    yc = y_col_ref[...]

    upper = j >= i                                     # K/L symmetry
    kl_w = (jnp.where(j > i, 2.0, 1.0) * beta).astype(jnp.float32)

    if single_k:
        # Fast path: whole (padded) D in one chunk; no Gram scratch traffic.
        zz = lax.dot_general(xr, yc, nt, preferred_element_type=jnp.float32)
        p_t = jnp.exp(zsqx_row_ref[...] + zsqy_col_ref[...] + two_z * zz)
        acc_ref[...] += (-gamma) * p_t

        @pl.when(upper)
        def _kl():
            xx = lax.dot_general(xr, xc, nt, preferred_element_type=jnp.float32)
            yy = lax.dot_general(yr, yc, nt, preferred_element_type=jnp.float32)
            k_t = jnp.exp(zsqx_row_ref[...] + zsqx_col_ref[...] + two_z * xx)
            l_t = jnp.exp(zsqy_row_ref[...] + zsqy_col_ref[...] + two_z * yy)
            acc_ref[...] += kl_w * (k_t + l_t)

        @pl.when(j == nj - 1)
        def _store():
            # One cross-sublane reduce per row block -> lane-dense (1, tn).
            out_ref[...] = jnp.sum(acc_ref[...], axis=0, keepdims=True)
    else:
        xx_ref, yy_ref, zz_ref = scratch[1], scratch[2], scratch[3]

        @pl.when(k == 0)
        def _init_gram():
            xx_ref[...] = jnp.zeros_like(xx_ref)
            yy_ref[...] = jnp.zeros_like(yy_ref)
            zz_ref[...] = jnp.zeros_like(zz_ref)

        zz_ref[...] += lax.dot_general(xr, yc, nt,
                                       preferred_element_type=jnp.float32)

        @pl.when(upper)
        def _gram_kl():
            xx_ref[...] += lax.dot_general(xr, xc, nt,
                                           preferred_element_type=jnp.float32)
            yy_ref[...] += lax.dot_general(yr, yc, nt,
                                           preferred_element_type=jnp.float32)

        last_k = k == num_k - 1

        @pl.when(last_k)
        def _acc_p():
            p_t = jnp.exp(zsqx_row_ref[...] + zsqy_col_ref[...]
                          + two_z * zz_ref[...])
            acc_ref[...] += (-gamma) * p_t

        @pl.when(last_k & upper)
        def _acc_kl():
            k_t = jnp.exp(zsqx_row_ref[...] + zsqx_col_ref[...]
                          + two_z * xx_ref[...])
            l_t = jnp.exp(zsqy_row_ref[...] + zsqy_col_ref[...]
                          + two_z * yy_ref[...])
            acc_ref[...] += kl_w * (k_t + l_t)

        @pl.when(last_k & (j == nj - 1))
        def _store():
            out_ref[...] = jnp.sum(acc_ref[...], axis=0, keepdims=True)


def mmd_loss(x, y, z_var, *, block=128, dk_max=2048, matmul_dtype=None):
    """Pallas implementation of MaximumMeanDiscrepancyLoss3.forward."""
    x = jnp.asarray(x)
    y = jnp.asarray(y)
    B, D = x.shape
    assert y.shape == (B, D)
    assert B >= 2, "MMD needs batch_size >= 2 (beta = 1/(B*(B-1)))"

    beta = 1.0 / (B * (B - 1))
    gamma = 2.0 / (B * B)

    # ---- tile / padding selection ------------------------------------------
    if B <= 128:
        # Single (or few) small tiles; keep sublane multiple of 8.
        tile = min(_round_up(B, 8), max(8, _round_up(block, 8)))
    else:
        # Lane-dense tiles; pick the candidate minimizing quadratic padding.
        cands = sorted({128, max(128, (block // 128) * 128)})
        best = None
        for t in cands:
            bp = _round_up(B, t)
            if best is None or bp < best[0] or (bp == best[0] and t > best[1]):
                best = (bp, t)
        _, tile = best
    b_pad = _round_up(B, tile)
    # v7x megacore: prefer >= 2 row blocks so both TensorCores get work.
    if b_pad // tile == 1 and tile > 128:
        tile = 128
        b_pad = _round_up(B, tile)
    num_blocks = b_pad // tile

    d_pad = _round_up(D, 128)
    num_k = -(-d_pad // dk_max)                    # cdiv
    dk = _round_up(-(-d_pad // num_k), 128)
    d_pad = dk * num_k
    single_k = num_k == 1

    # ---- pad + precompute ----------------------------------------------------
    xp = jnp.pad(x, ((0, b_pad - B), (0, d_pad - D)))
    yp = jnp.pad(y, ((0, b_pad - B), (0, d_pad - D)))
    if matmul_dtype is not None:
        xs = xp.astype(matmul_dtype)
        ys = yp.astype(matmul_dtype)
    else:
        xs, ys = xp, yp                             # native dtype into the MXU

    zf = jnp.asarray(z_var, jnp.float32).reshape(())
    xf = xp.astype(jnp.float32)
    yf = yp.astype(jnp.float32)
    sqx = jnp.sum(xf * xf, axis=1)                  # (b_pad,)
    sqy = jnp.sum(yf * yf, axis=1)
    valid = jnp.arange(b_pad) < B
    # (-z)*||.||^2 with a finite sentinel on padded rows/cols: exp -> 0 exactly,
    # for any z_var (sentinel is not multiplied by z, so z_var == 0 stays exact).
    zsqx = jnp.where(valid, -zf * sqx, _NEG_BIG).astype(jnp.float32)
    zsqy = jnp.where(valid, -zf * sqy, _NEG_BIG).astype(jnp.float32)
    zsqx_row = zsqx[:, None]                        # (b_pad, 1)
    zsqy_row = zsqy[:, None]
    zsqx_col = zsqx.reshape(num_blocks, 1, tile)    # (nb, 1, tile) lane rows
    zsqy_col = zsqy.reshape(num_blocks, 1, tile)
    two_z = (2.0 * zf).reshape((1,))                # SMEM scalar

    kernel = functools.partial(
        _mmd_tile_kernel,
        beta=beta, gamma=gamma, num_k=num_k, single_k=single_k)

    row_spec = pl.BlockSpec((tile, dk), lambda i, j, k: (i, k))
    col_spec = pl.BlockSpec((tile, dk), lambda i, j, k: (j, k))
    zsq_row_spec = pl.BlockSpec((tile, 1), lambda i, j, k: (i, 0))
    zsq_col_spec = pl.BlockSpec((None, 1, tile), lambda i, j, k: (j, 0, 0))
    out_spec = pl.BlockSpec((None, 1, tile), lambda i, j, k: (i, 0, 0))

    scratch_shapes = [pltpu.VMEM((tile, tile), jnp.float32)]     # running sum
    if not single_k:
        scratch_shapes += [pltpu.VMEM((tile, tile), jnp.float32)] * 3  # xx/yy/zz

    # ---- VMEM budget (no double-counting; includes intermediates) ----------
    itemsize = jnp.dtype(xs.dtype).itemsize
    stream_bytes = 4 * 2 * tile * dk * itemsize          # 4 double-buffered blocks
    acc_bytes = len(scratch_shapes) * tile * tile * 4    # sum acc (+ gram accs)
    interm_bytes = 6 * tile * tile * 4                   # xx/yy/zz/k/l/p headroom
    misc_bytes = 2 * tile * 4 + 16 * tile * 4 + (1 << 20)
    vmem_bytes = stream_bytes + acc_bytes + interm_bytes + misc_bytes
    vmem_limit = int(min(max(vmem_bytes, 16 << 20), 48 << 20))   # < v7x 64 MiB

    nb = num_blocks
    total_tiles = nb * nb
    upper_tiles = nb * (nb + 1) // 2
    cost = pl.CostEstimate(
        flops=2 * tile * tile * d_pad * (total_tiles + 2 * upper_tiles)
        + 10 * tile * tile * (total_tiles + upper_tiles),
        transcendentals=tile * tile * (total_tiles + 2 * upper_tiles),
        bytes_accessed=4 * total_tiles * num_k * tile * dk * itemsize
        + nb * tile * 4 + 4 * b_pad * 4)

    partials = pl.pallas_call(
        kernel,
        out_shape=jax.ShapeDtypeStruct((num_blocks, 1, tile), jnp.float32),
        grid=(num_blocks, num_blocks, num_k),
        in_specs=[
            pl.BlockSpec(memory_space=pltpu.MemorySpace.SMEM),   # 2*z scalar
            row_spec,        # x row block
            row_spec,        # y row block
            col_spec,        # x col block
            col_spec,        # y col block
            zsq_row_spec,    # (-z)||x_i||^2  (tm, 1)
            zsq_row_spec,    # (-z)||y_i||^2  (tm, 1)
            zsq_col_spec,    # (-z)||x_j||^2  (1, tn)
            zsq_col_spec,    # (-z)||y_j||^2  (1, tn)
        ],
        out_specs=out_spec,
        scratch_shapes=scratch_shapes,
        compiler_params=pltpu.CompilerParams(
            dimension_semantics=("parallel", "arbitrary", "arbitrary"),
            vmem_limit_bytes=vmem_limit),
        cost_estimate=cost,
    )(two_z, xs, ys, xs, ys, zsqx_row, zsqy_row, zsqx_col, zsqy_col)

    # beta/gamma already folded per tile; final lane reduce + abs in XLA.
    return jnp.abs(jnp.sum(partials))


def _reference(x, y, z_var):
    # Pure-JAX reference mirroring the PyTorch module exactly.
    B = x.shape[0]
    xx = x @ x.T
    yy = y @ y.T
    zz = x @ y.T
    rx = jnp.broadcast_to(jnp.diag(xx)[None, :], xx.shape)
    ry = jnp.broadcast_to(jnp.diag(yy)[None, :], yy.shape)
    K = jnp.exp(-z_var * (rx.T + rx - 2 * xx))
    L = jnp.exp(-z_var * (ry.T + ry - 2 * yy))
    P = jnp.exp(-z_var * (rx.T + ry - 2 * zz))
    beta = 1.0 / (B * (B - 1))
    gamma = 2.0 / (B * B)
    return jnp.abs(beta * (jnp.sum(K) + jnp.sum(L)) - gamma * jnp.sum(P))


if __name__ == "__main__":
    key = jax.random.PRNGKey(0)
    kx, ky = jax.random.split(key)

    # Case 1: tiny single-tile path (B=8, D=32 -> one (8,128) block, 1x1x1 grid).
    B, D = 8, 32
    x = jax.random.normal(kx, (B, D), dtype=jnp.float32)
    y = jax.random.normal(ky, (B, D), dtype=jnp.float32)
    out = jax.block_until_ready(mmd_loss(x, y, 2.0))
    ref = _reference(x, y, jnp.float32(2.0))
    assert jnp.allclose(out, ref, rtol=1e-4, atol=1e-5), (out, ref)

    # Case 2: multi-block + symmetry + sentinel-masked padding
    # (B=20 padded to 24, 3x3 grid of 8x8 tiles).
    B2, D2 = 20, 32
    x2 = jax.random.normal(kx, (B2, D2), dtype=jnp.float32)
    y2 = jax.random.normal(ky, (B2, D2), dtype=jnp.float32)
    out2 = jax.block_until_ready(mmd_loss(x2, y2, 0.5, block=8))
    ref2 = _reference(x2, y2, jnp.float32(0.5))
    assert jnp.allclose(out2, ref2, rtol=1e-4, atol=1e-5), (out2, ref2)

    # Case 3: D-chunked K-reduction path (D=300 padded to 384, 3 chunks of 128).
    B3, D3 = 20, 300
    x3 = jax.random.normal(kx, (B3, D3), dtype=jnp.float32)
    y3 = jax.random.normal(ky, (B3, D3), dtype=jnp.float32)
    out3 = jax.block_until_ready(mmd_loss(x3, y3, 0.1, block=8, dk_max=128))
    ref3 = _reference(x3, y3, jnp.float32(0.1))
    assert jnp.allclose(out3, ref3, rtol=1e-4, atol=1e-5), (out3, ref3)

    # Case 4: default lane-dense path (B=130 padded to 256, 2x2 grid of 128 tiles).
    B4, D4 = 130, 32
    x4 = jax.random.normal(kx, (B4, D4), dtype=jnp.float32)
    y4 = jax.random.normal(ky, (B4, D4), dtype=jnp.float32)
    out4 = jax.block_until_ready(mmd_loss(x4, y4, 0.25))
    ref4 = _reference(x4, y4, jnp.float32(0.25))
    assert jnp.allclose(out4, ref4, rtol=1e-4, atol=1e-5), (out4, ref4)

    print("KERNEL_OK")
</pallas_src>

<mosaic_0001>
module attributes {stable_mosaic.version = 11 : i64} {
  func.func @_mmd_tile_kernel(%arg0: i32, %arg1: i32, %arg2: i32, %arg3: memref<1xf32, #tpu.memory_space<smem>>, %arg4: memref<8x128xf32, #tpu.memory_space<vmem>>, %arg5: memref<8x128xf32, #tpu.memory_space<vmem>>, %arg6: memref<8x128xf32, #tpu.memory_space<vmem>>, %arg7: memref<8x128xf32, #tpu.memory_space<vmem>>, %arg8: memref<8x1xf32, #tpu.memory_space<vmem>>, %arg9: memref<8x1xf32, #tpu.memory_space<vmem>>, %arg10: memref<1x1x8xf32, #tpu.memory_space<vmem>>, %arg11: memref<1x1x8xf32, #tpu.memory_space<vmem>>, %arg12: memref<1x1x8xf32, #tpu.memory_space<vmem>>, %arg13: memref<8x8xf32, #tpu.memory_space<vmem>>) attributes {dimension_semantics = [#tpu.dimension_semantics<parallel>, #tpu.dimension_semantics<arbitrary>, #tpu.dimension_semantics<arbitrary>], iteration_bounds = array<i64: 1, 1, 1>, scalar_prefetch = 0 : i64, scratch_operands = 1 : i64, tpu.core_type = #tpu.core_type<tc>, window_params = [{transform_indices = @transform_0, window_bounds = array<i64: 1>}, {transform_indices = @transform_1, window_bounds = array<i64: 8, 128>}, {transform_indices = @transform_2, window_bounds = array<i64: 8, 128>}, {transform_indices = @transform_3, window_bounds = array<i64: 8, 128>}, {transform_indices = @transform_4, window_bounds = array<i64: 8, 128>}, {transform_indices = @transform_5, window_bounds = array<i64: 8, 1>}, {transform_indices = @transform_6, window_bounds = array<i64: 8, 1>}, {transform_indices = @transform_7, window_bounds = array<i64: 1, 1, 8>}, {transform_indices = @transform_8, window_bounds = array<i64: 1, 1, 8>}, {transform_indices = @transform_9, window_bounds = array<i64: 1, 1, 8>}]} {
    %c0_i32 = arith.constant 0 : i32
    %0 = arith.cmpi eq, %arg1, %c0_i32 : i32
    %c0_i32_0 = arith.constant 0 : i32
    %1 = arith.cmpi eq, %arg2, %c0_i32_0 : i32
    %2 = arith.andi %0, %1 : i1
    %3 = arith.extui %2 : i1 to i32
    %c0_i32_1 = arith.constant 0 : i32
    %4 = arith.cmpi ne, %3, %c0_i32_1 : i32
    scf.if %4 {
      %cst_26 = arith.constant 0.000000e+00 : f32
      %35 = vector.broadcast %cst_26 : f32 to vector<8x8xf32>
      %c0_27 = arith.constant 0 : index
      %c0_28 = arith.constant 0 : index
      %36 = vector.load %arg13[%c0_27, %c0_28] : memref<8x8xf32, #tpu.memory_space<vmem>>, vector<8x8xf32>
      tpu.vector_store %arg13[%c0_27, %c0_28], %35 {strides = array<i32>} : memref<8x8xf32, #tpu.memory_space<vmem>>, vector<8x8xf32>,
    } else {
    }
    %c0 = arith.constant 0 : index
    %5 = memref.load %arg3[%c0] : memref<1xf32, #tpu.memory_space<smem>>
    %c0_2 = arith.constant 0 : index
    %c0_3 = arith.constant 0 : index
    %6 = vector.load %arg4[%c0_2, %c0_3] : memref<8x128xf32, #tpu.memory_space<vmem>>, vector<8x128xf32>
    %c0_4 = arith.constant 0 : index
    %c0_5 = arith.constant 0 : index
    %7 = vector.load %arg5[%c0_4, %c0_5] : memref<8x128xf32, #tpu.memory_space<vmem>>, vector<8x128xf32>
    %c0_6 = arith.constant 0 : index
    %c0_7 = arith.constant 0 : index
    %8 = vector.load %arg6[%c0_6, %c0_7] : memref<8x128xf32, #tpu.memory_space<vmem>>, vector<8x128xf32>
    %c0_8 = arith.constant 0 : index
    %c0_9 = arith.constant 0 : index
    %9 = vector.load %arg7[%c0_8, %c0_9] : memref<8x128xf32, #tpu.memory_space<vmem>>, vector<8x128xf32>
    %10 = arith.cmpi sge, %arg1, %arg0 : i32
    %11 = arith.cmpi sgt, %arg1, %arg0 : i32
    %cst = arith.constant 2.000000e+00 : f32
    %cst_10 = arith.constant 1.000000e+00 : f32
    %12 = arith.select %11, %cst, %cst_10 : f32
    %cst_11 = arith.constant 0.0178571437 : f32
    %13 = arith.mulf %12, %cst_11 : f32
    %cst_12 = arith.constant dense<0.000000e+00> : vector<8x8xf32>
    %14 = tpu.matmul %6, %9, %cst_12 {dimension_numbers = #tpu.dot_dimension_numbers<[1], [1], [0], [0], [0, 0, 1, 0], [], []>} : vector<8x128xf32>, vector<8x128xf32>, vector<8x8xf32> -> vector<8x8xf32>
    %c0_13 = arith.constant 0 : index
    %c0_14 = arith.constant 0 : index
    %15 = vector.load %arg8[%c0_13, %c0_14] : memref<8x1xf32, #tpu.memory_space<vmem>>, vector<8x1xf32>
    %c0_15 = arith.constant 0 : index
    %c0_16 = arith.constant 0 : index
    %c0_17 = arith.constant 0 : index
    %16 = vector.load %arg11[%c0_15, %c0_16, %c0_17] : memref<1x1x8xf32, #tpu.memory_space<vmem>>, vector<1x1x8xf32>
    %17 = vector.shape_cast %16 : vector<1x1x8xf32> to vector<1x8xf32>
    %18 = vector.broadcast %15 : vector<8x1xf32> to vector<8x8xf32>
    %19 = vector.broadcast %17 : vector<1x8xf32> to vector<8x8xf32>
    %20 = arith.addf %18, %19 : vector<8x8xf32>
    %21 = vector.broadcast %5 : f32 to vector<8x8xf32>
    %22 = arith.mulf %21, %14 : vector<8x8xf32>
    %23 = arith.addf %20, %22 : vector<8x8xf32>
    %24 = math.exp %23 : vector<8x8xf32>
    %c0_18 = arith.constant 0 : index
    %c0_19 = arith.constant 0 : index
    %25 = vector.load %arg13[%c0_18, %c0_19] : memref<8x8xf32, #tpu.memory_space<vmem>>, vector<8x8xf32>
    %cst_20 = arith.constant -3.125000e-02 : f32
    %26 = vector.broadcast %cst_20 : f32 to vector<8x8xf32>
    %27 = arith.mulf %26, %24 : vector<8x8xf32>
    %28 = arith.addf %25, %27 : vector<8x8xf32>
    %c0_21 = arith.constant 0 : index
    %c0_22 = arith.constant 0 : index
    %29 = vector.load %arg13[%c0_21, %c0_22] : memref<8x8xf32, #tpu.memory_space<vmem>>, vector<8x8xf32>
    tpu.vector_store %arg13[%c0_21, %c0_22], %28 {strides = array<i32>} : memref<8x8xf32, #tpu.memory_space<vmem>>, vector<8x8xf32>,
    %30 = arith.extui %10 : i1 to i32
    %c0_i32_23 = arith.constant 0 : i32
    %31 = arith.cmpi ne, %30, %c0_i32_23 : i32
    scf.if %31 {
      %cst_26 = arith.constant dense<0.000000e+00> : vector<8x8xf32>
      %35 = tpu.matmul %6, %8, %cst_26 {dimension_numbers = #tpu.dot_dimension_numbers<[1], [1], [0], [0], [0, 0, 1, 0], [], []>} : vector<8x128xf32>, vector<8x128xf32>, vector<8x8xf32> -> vector<8x8xf32>
      %cst_27 = arith.constant dense<0.000000e+00> : vector<8x8xf32>
      %36 = tpu.matmul %7, %9, %cst_27 {dimension_numbers = #tpu.dot_dimension_numbers<[1], [1], [0], [0], [0, 0, 1, 0], [], []>} : vector<8x128xf32>, vector<8x128xf32>, vector<8x8xf32> -> vector<8x8xf32>
      %c0_28 = arith.constant 0 : index
      %c0_29 = arith.constant 0 : index
      %37 = vector.load %arg8[%c0_28, %c0_29] : memref<8x1xf32, #tpu.memory_space<vmem>>, vector<8x1xf32>
      %c0_30 = arith.constant 0 : index
      %c0_31 = arith.constant 0 : index
      %c0_32 = arith.constant 0 : index
      %38 = vector.load %arg10[%c0_30, %c0_31, %c0_32] : memref<1x1x8xf32, #tpu.memory_space<vmem>>, vector<1x1x8xf32>
      %39 = vector.shape_cast %38 : vector<1x1x8xf32> to vector<1x8xf32>
      %40 = vector.broadcast %37 : vector<8x1xf32> to vector<8x8xf32>
      %41 = vector.broadcast %39 : vector<1x8xf32> to vector<8x8xf32>
      %42 = arith.addf %40, %41 : vector<8x8xf32>
      %43 = vector.broadcast %5 : f32 to vector<8x8xf32>
      %44 = arith.mulf %43, %35 : vector<8x8xf32>
      %45 = arith.addf %42, %44 : vector<8x8xf32>
      %46 = math.exp %45 : vector<8x8xf32>
      %c0_33 = arith.constant 0 : index
      %c0_34 = arith.constant 0 : index
      %47 = vector.load %arg9[%c0_33, %c0_34] : memref<8x1xf32, #tpu.memory_space<vmem>>, vector<8x1xf32>
      %c0_35 = arith.constant 0 : index
      %c0_36 = arith.constant 0 : index
      %c0_37 = arith.constant 0 : index
      %48 = vector.load %arg11[%c0_35, %c0_36, %c0_37] : memref<1x1x8xf32, #tpu.memory_space<vmem>>, vector<1x1x8xf32>
      %49 = vector.shape_cast %48 : vector<1x1x8xf32> to vector<1x8xf32>
      %50 = vector.broadcast %47 : vector<8x1xf32> to vector<8x8xf32>
      %51 = vector.broadcast %49 : vector<1x8xf32> to vector<8x8xf32>
      %52 = arith.addf %50, %51 : vector<8x8xf32>
      %53 = vector.broadcast %5 : f32 to vector<8x8xf32>
      %54 = arith.mulf %53, %36 : vector<8x8xf32>
      %55 = arith.addf %52, %54 : vector<8x8xf32>
      %56 = math.exp %55 : vector<8x8xf32>
      %c0_38 = arith.constant 0 : index
      %c0_39 = arith.constant 0 : index
      %57 = vector.load %arg13[%c0_38, %c0_39] : memref<8x8xf32, #tpu.memory_space<vmem>>, vector<8x8xf32>
      %58 = arith.addf %46, %56 : vector<8x8xf32>
      %59 = vector.broadcast %13 : f32 to vector<8x8xf32>
      %60 = arith.mulf %59, %58 : vector<8x8xf32>
      %61 = arith.addf %57, %60 : vector<8x8xf32>
      %c0_40 = arith.constant 0 : index
      %c0_41 = arith.constant 0 : index
      %62 = vector.load %arg13[%c0_40, %c0_41] : memref<8x8xf32, #tpu.memory_space<vmem>>, vector<8x8xf32>
      tpu.vector_store %arg13[%c0_40, %c0_41], %61 {strides = array<i32>} : memref<8x8xf32, #tpu.memory_space<vmem>>, vector<8x8xf32>,
    } else {
    }
    %c0_i32_24 = arith.constant 0 : i32
    %32 = arith.cmpi eq, %arg1, %c0_i32_24 : i32
    %33 = arith.extui %32 : i1 to i32
    %c0_i32_25 = arith.constant 0 : i32
    %34 = arith.cmpi ne, %33, %c0_i32_25 : i32
    scf.if %34 {
      %c0_26 = arith.constant 0 : index
      %c0_27 = arith.constant 0 : index
      %35 = vector.load %arg13[%c0_26, %c0_27] : memref<8x8xf32, #tpu.memory_space<vmem>>, vector<8x8xf32>
      %cst_28 = arith.constant dense<0.000000e+00> : vector<8xf32>
      %36 = vector.multi_reduction <add>, %35, %cst_28 [0] : vector<8x8xf32> to vector<8xf32>
      %37 = vector.shape_cast %36 : vector<8xf32> to vector<1x8xf32>
      %c0_29 = arith.constant 0 : index
      %c0_30 = arith.constant 0 : index
      %c0_31 = arith.constant 0 : index
      %38 = vector.load %arg12[%c0_29, %c0_30, %c0_31] : memref<1x1x8xf32, #tpu.memory_space<vmem>>, vector<1x1x8xf32>
      %39 = vector.shape_cast %38 : vector<1x1x8xf32> to vector<1x8xf32>
      %40 = vector.shape_cast %37 : vector<1x8xf32> to vector<1x1x8xf32>
      tpu.vector_store %arg12[%c0_29, %c0_30, %c0_31], %40 {strides = array<i32>} : memref<1x1x8xf32, #tpu.memory_space<vmem>>, vector<1x1x8xf32>,
    } else {
    }
    return
  }
  func.func @transform_0(%arg0: i32, %arg1: i32, %arg2: i32) -> i32 {
    %c0_i32 = arith.constant 0 : i32
    %c0_i32_0 = arith.constant 0 : i32
    return %c0_i32 : i32
  }
  func.func @transform_1(%arg0: i32, %arg1: i32, %arg2: i32) -> (i32, i32) {
    %c0_i32 = arith.constant 0 : i32
    return %arg0, %arg2 : i32, i32
  }
  func.func @transform_2(%arg0: i32, %arg1: i32, %arg2: i32) -> (i32, i32) {
    %c0_i32 = arith.constant 0 : i32
    return %arg0, %arg2 : i32, i32
  }
  func.func @transform_3(%arg0: i32, %arg1: i32, %arg2: i32) -> (i32, i32) {
    %c0_i32 = arith.constant 0 : i32
    return %arg1, %arg2 : i32, i32
  }
  func.func @transform_4(%arg0: i32, %arg1: i32, %arg2: i32) -> (i32, i32) {
    %c0_i32 = arith.constant 0 : i32
    return %arg1, %arg2 : i32, i32
  }
  func.func @transform_5(%arg0: i32, %arg1: i32, %arg2: i32) -> (i32, i32) {
    %c0_i32 = arith.constant 0 : i32
    %c0_i32_0 = arith.constant 0 : i32
    return %arg0, %c0_i32 : i32, i32
  }
  func.func @transform_6(%arg0: i32, %arg1: i32, %arg2: i32) -> (i32, i32) {
    %c0_i32 = arith.constant 0 : i32
    %c0_i32_0 = arith.constant 0 : i32
    return %arg0, %c0_i32 : i32, i32
  }
  func.func @transform_7(%arg0: i32, %arg1: i32, %arg2: i32) -> (i32, i32, i32) {
    %c0_i32 = arith.constant 0 : i32
    %c0_i32_0 = arith.constant 0 : i32
    %c0_i32_1 = arith.constant 0 : i32
    return %arg1, %c0_i32, %c0_i32_0 : i32, i32, i32
  }
  func.func @transform_8(%arg0: i32, %arg1: i32, %arg2: i32) -> (i32, i32, i32) {
    %c0_i32 = arith.constant 0 : i32
    %c0_i32_0 = arith.constant 0 : i32
    %c0_i32_1 = arith.constant 0 : i32
    return %arg1, %c0_i32, %c0_i32_0 : i32, i32, i32
  }
  func.func @transform_9(%arg0: i32, %arg1: i32, %arg2: i32) -> (i32, i32, i32) {
    %c0_i32 = arith.constant 0 : i32
    %c0_i32_0 = arith.constant 0 : i32
    %c0_i32_1 = arith.constant 0 : i32
    return %arg0, %c0_i32, %c0_i32_0 : i32, i32, i32
  }
}

</mosaic_0001>

<bundles_post_ra>
// kernel: tpu_custom_call.1
= control target key start
LH: loop header
LB: loop body
LE: loop exit
PB: predicated region body
PF: predicated region fallthrough
CT: control target
= control target key end

     0   :  { %15 = vsyncpa [#allocation5], 0  ;;  %s543_s0 = inlined_call_operand.<no memory space> [shape: f32[1], index: 0, kind: input, shape index: {}]   ;;  %s544_s1 = inlined_call_operand.vmem [shape: f32[8,128], index: 1, kind: input, shape index: {}]   ;;  %s545_s2 = inlined_call_operand.vmem [shape: f32[8,128], index: 2, kind: input, shape index: {}]   ;;  %s546_s3 = inlined_call_operand.hbm [shape: f32[8,128], index: 3, kind: input, shape index: {}]   ;;  %s547_s4 = inlined_call_operand.vmem [shape: f32[8,128], index: 4, kind: input, shape index: {}]   ;;  %s548_s5 = inlined_call_operand.vmem [shape: f32[8,1], index: 5, kind: input, shape index: {}]   ;;  %s549_s6 = inlined_call_operand.vmem [shape: f32[8,1], index: 6, kind: input, shape index: {}]   ;;  %s550_s7 = inlined_call_operand.vmem [shape: f32[1,1,8], index: 7, kind: input, shape index: {}]   ;;  %s551_s8 = inlined_call_operand.vmem [shape: f32[1,1,8], index: 8, kind: input, shape index: {}]   ;;  %s552_s9 = inlined_call_operand.hbm [shape: f32[1,1,8], index: 9, kind: output, shape index: {}]  }
   0x1   :  { %16 = vsyncpa [#allocation6], 0  ;;  %s451_s30 = smov [#allocation4]  }
   0x2   :  { %s29_s10 = sshll.u32 %s451_s30, 4  ;;  %s30_s10 = int_to_ptr.vmem [resolvable:$true] %s29_s10 }
   0x3   :  { %s415_s11 = scalar_lea.vmem %s30_s10, 128  ;;  %p420_p1 = scmp.lt.s32.totalorder %s30_s10, %s30_s10 }
   0x4   :  { %p416_p0 = scmp.ne.s32.totalorder %s30_s10, %s415_s11  ;;  %p421_p2 = scmp.lt.s32.totalorder %s415_s11, %s415_s11 }
   0x6   :  { %p422_p3 = por %p421_p2, %p420_p1 }
   0x8   :  { %p423_p4 = pnand %p422_p3, %p416_p0 }
   0xa   :  { %426 = shalt.err (!%p423_p4)
}
   0xb   :  { %32 = dma.hbm_to_vmem [thread:$0]  %s546_s3, 128, %s30_s10, [#allocation5]  }
   0xc   :  { %447 = dma.done.wait [#allocation5], 128  }
   0xd   :  { %448 = vsyncadd [#allocation5], 4294967168  ;;  %v452_v0 = vmov 0.0   ;;  %vm453_vm0 = vmmov 0   ;;  %v454_v1 = vmov 0   ;;  %v58_v2 = vld [vmem:[%s547_s4] sm:$0xff]  ;;  %v147_v12 = vstv %s543_s0 }
   0xe   :  { %379 = vmatprep.subr.mxu0 %v452_v0  ;;  %384 = vmatprep.subr.mxu1 %v452_v0  ;;  %v57_v3 = vld [vmem:[#allocation4] sm:$0xff]  ;;  %v55_v4 = vld [vmem:[%s544_s1] sm:$0xff]  ;;  %vm52_vm1 = vcmask 64512   ;;  %s455_s0 = smov [#allocation7]   ;;  %vm353_vm2 = vcmask 57344  }
   0xf   :  { %381 = vmatprep.mubr.msk.f32.mxu0 %vm453_vm0, %v452_v0  ;;  %386 = vmatprep.mubr.msk.f32.mxu1 %vm453_vm0, %v452_v0  ;;  %v133_v5 = vld [vmem:[%s548_s5] sm:$0xff]  ;;  %53 = vst.msk [vmem:[#allocation2] sm:$0xff] %vm52_vm1, %v452_v0 }
  0x10   :  { %399 = vset.pattern.permute.xlu0 %v454_v1  ;;  %400 = vset.pattern.permute.xlu1 %v454_v1  ;;  %v318_v6 = vld [vmem:[%s549_s6] sm:$0xff] }
  0x11   :  { %380 = vmatpush3.xpose.msra.mxu0 %v58_v2  ;;  %385 = vmatpush3.xpose.msra.mxu1 %v57_v3  ;;  %v56_v7 = vld [vmem:[%s545_s2] sm:$0xff]  ;;  %s361_s2 = sshll.u32 %s455_s0, 4  ;;  %s362_s2 = int_to_ptr.vmem [resolvable:$true] %s361_s2 }
  0x12   :  { %389 = vmatprep.subr.mxu0 %v452_v0  ;;  %137 = vperm.xlu0 %399, %v133_v5   ;;  %v370_v9 = vld [vmem:[%s551_s8] ss:$0 sm:$0xff]  ;;  %s431_s8 = scalar_lea.vmem %s362_s2, 32  ;;  %p432_p6 = scmp.lt.s32.totalorder %s362_s2, %s362_s2 }
  0x13   :  { %322 = vperm.xlu1 %400, %v318_v6   ;;  %v371_v10 = vld [vmem:[%s550_s7] ss:$0 sm:$0xff]  ;;  %s427_s7 = scalar_lea.vmem %s362_s2, 16 }
  0x14   :  { %382 = vmatmul.mubr.f32.vlgmr.msra.gmra.mxu0 %v55_v4  ;;  %387 = vmatmul.mubr.f32.vlgmr.msra.gmra.mxu1 %v55_v4  ;;  %p428_p5 = scmp.ne.s32.totalorder %s362_s2, %s427_s7  ;;  %p433_p7 = scmp.lt.s32.totalorder %s431_s8, %s427_s7 }
  0x15   :  { %390 = vmatpush3.xpose.msra.mxu0 %v58_v2  ;;  %391 = vmatprep.mubr.msk.f32.mxu0 %vm453_vm0, %v452_v0 }
  0x16   :  { %304 = vperm.xlu0 %399, %v133_v5   ;;  %v152_v33 = vld [vmem:[#allocation2] sm:$0xff]  ;;  %p434_p8 = por %p433_p7, %p432_p6 }
  0x18   :  { %392 = vmatmul.mubr.f32.vlgmr.msra.gmra.mxu0 %v56_v7  ;;  %p435_p9 = pnand %p434_p8, %p428_p5 }
  0x8d   :  { %v138_v8 = vpop.permute.xlu0 %137 }
  0x8e   :  { %v146_v13 = vadd.f32 %v370_v9, %v138_v8  ;;  %v323_v14 = vpop.permute.xlu1 %322 }
  0x8f   :  { %v331_v23 = vadd.f32 %v370_v9, %v323_v14 }
  0x91   :  { %v305_v11 = vpop.permute.xlu0 %304 }
  0x92   :  { %v313_v17 = vadd.f32 %v371_v10, %v305_v11 }
  0xd4   :  { %v129_v15 = vpop.f32.mrf.mxu0  ;;  %v226_v16 = vpop.f32.mrf.mxu1 }
  0xd5   :  { %v148_v18 = vmul.f32 %v147_v12, %v129_v15  ;;  %v314_v19 = vmul.f32 %v226_v16, %v147_v12 }
  0xd6   :  { %v383_v20 = vpop.f32.mrf.mxu0  ;;  %v388_v21 = vpop.f32.mrf.mxu1 }
  0xd7   :  { %v149_v22 = vadd.f32 %v148_v18, %v146_v13  ;;  %v315_v26 = vadd.f32 %v314_v19, %v313_v17 }
  0xd8   :  { %v296_v24 = vpop.f32.mrf.mxu0 }
  0xd9   :  { %v150_v25 = vmul.f32 1.442695, %v149_v22  ;;  %v332_v27 = vmul.f32 %v296_v24, %v147_v12  ;;  %v316_v30 = vmul.f32 1.442695, %v315_v26 }
  0xda   :  { %v393_v28 = vpop.f32.mrf.mxu0 }
  0xdb   :  { %401 = vpow2.f32 %v150_v25  ;;  %v333_v29 = vadd.f32 %v332_v27, %v331_v23 }
  0xdd   :  { %v334_v31 = vmul.f32 1.442695, %v333_v29 }
  0xdf   :  { %403 = vpow2.f32 %v334_v31 }
  0xe0   :  { %405 = vpow2.f32 %v316_v30 }
  0xe8   :  { %v402_v32 = vpop.eup %401 }
  0xe9   :  { %v153_v34 = vmul.f32 -0.03125, %v402_v32 }
  0xeb   :  { %v154_v35 = vadd.f32 %v153_v34, %v152_v33 }
  0xec   :  { %v404_v36 = vpop.eup %403 }
  0xed   :  { %156 = vst.msk [vmem:[#allocation2] sm:$0xff] %vm52_vm1, %v154_v35  ;;  %v406_v37 = vpop.eup %405 }
  0xee   :  { %v337_v38 = vadd.f32 %v406_v37, %v404_v36 }
  0xf0   :  { %v339_v39 = vmul.f32 0.017857144, %v337_v38 }
  0xf4   :  { %v336_v40 = vld [vmem:[#allocation2] sm:$0xff] }
  0xf5   :  { %v340_v41 = vadd.f32 %v339_v39, %v336_v40 }
  0xf7   :  { %341 = vst.msk [vmem:[#allocation2] sm:$0xff] %vm52_vm1, %v340_v41 }
  0xfe   :  { %v345_v42 = vld [vmem:[#allocation2] sm:$0xff] }
  0xff   :  { %v346_v43 = vsel %vm52_vm1, %v345_v42, 0.0 }
 0x100   :  { %v347_v44 = vrot.slane %v346_v43, 4 }
 0x102   :  { %v348_v45 = vadd.f32 %v347_v44, %v346_v43 }
 0x104   :  { %v349_v46 = vrot.slane %v348_v45, 2 }
 0x106   :  { %v350_v47 = vadd.f32 %v349_v46, %v348_v45 }
 0x108   :  { %v351_v48 = vrot.slane %v350_v47, 1 }
 0x10a   :  { %v352_v49 = vadd.f32 %v351_v48, %v350_v47 }
 0x10c   :  { %354 = vst.msk [vmem:[#allocation7] sm:$0x1] %vm353_vm2, %v352_v49 }
 0x10d   :  { %438 = shalt.err (!%p435_p9)
}
 0x10e   :  { %364 = dma.vmem_to_hbm [thread:$0]  %s362_s2, 16, %s552_s9, [#allocation6]  }
 0x10f   :  { %449 = dma.done.wait [#allocation6], 16  }
 0x110   :  { %450 = vsyncadd [#allocation6], 4294967280 }
 0x111   :  { %368 = vsyncpa [#allocation5], 1 }
 0x112   :  { %369 = vsyncpa [#allocation6], 1 }

</bundles_post_ra>
